<compile_context>
chip_gen: v6e
topology: v6e:2x2x1
jax: 0.10.0
libtpu: 0.0.40
codegen_flags: <defaults>
</compile_context>

<pallas_src>
import jax
import jax.numpy as jnp
from jax.experimental import pallas as pl
from jax.experimental.pallas import tpu as pltpu


def _upsample_kernel(x_ref, w_ref, b_ref, o_ref):
    # x_ref : (1, C_in, TL)        current batch element / length tile
    # w_ref : (2*C_out, C_in)      rows [0:C_out] = tap 0, rows [C_out:] = tap 1
    # b_ref : (2*C_out, 1)         bias duplicated per tap (f32)
    # o_ref : (1, C_out, 2*TL)     final, already-interleaved output tile
    c_out = o_ref.shape[1]
    tl = x_ref.shape[2]

    x = x_ref[0]                                                   # (C_in, TL)
    # One fused MXU call for both kernel taps, f32 accumulation.
    y = jnp.dot(w_ref[...], x, preferred_element_type=jnp.float32)
    y = y + b_ref[...]                                             # (2*C_out, TL)

    # Interleave the two taps along the lane (length) axis:
    #   out[co, 2*l + k] = y[k*C_out + co, l]
    # TODO(synk): audit this lane merge with pl.lower_as_mlir; if it lowers to a
    # materialized relayout, replace with pltpu.einshape / an explicit XLU zip.
    out = jnp.stack([y[:c_out, :], y[c_out:, :]], axis=-1).reshape(c_out, 2 * tl)
    o_ref[0] = out.astype(o_ref.dtype)


def _round_up(v, m):
    return ((v + m - 1) // m) * m


def _plan_length_tiling(N, C_in, C_out, L, max_tl, itemsize):
    """Pick (TL, L_pad, vmem_limit_bytes).

    Whenever the length axis is tiled, TL is a multiple of 128 (lane-dense,
    unmasked stores) and L_pad % TL == 0. Double-buffered tiles + the resident
    fused weight block fit a conservative VMEM budget (safe on v7x's 64 MiB).
    """
    budget = 40 << 20
    # Resident fused weights + bias (count double-buffered to be conservative).
    resident = 2 * (2 * C_out * C_in + 2 * C_out) * itemsize
    # Per unit of TL: double-buffered x tile rows + double-buffered output tile
    # rows (2*TL wide) + f32 temporaries for the fused result / interleave.
    per_len = 2 * C_in * itemsize + 4 * C_out * itemsize + 16 * C_out
    cap = (budget - resident) // max(per_len, 1)
    eff_max_tl = max(128, (min(max_tl, max(cap, 128)) // 128) * 128)

    # v7x has 2 TensorCores: with a single batch element make sure the grid has
    # at least 2 length tiles when that is free (harmless on single-TC v5e/v6e).
    if N == 1 and L >= 256 and L % 256 == 0:
        eff_max_tl = min(eff_max_tl, max(128, ((L // 2) // 128) * 128))

    if L <= eff_max_tl:
        tl, l_pad = L, L                      # single block: block dims == array dims
    else:
        tl, l_pad = None, L
        # Prefer a multiple-of-128 divisor of L (zero padding, lane-dense stores).
        for d in range(eff_max_tl // 128, 0, -1):
            if L % (128 * d) == 0:
                tl = 128 * d
                break
        if tl is None:
            # Otherwise pad L to a multiple of 128 and take the largest
            # multiple-of-128 divisor of the padded length (>= 128 always works).
            # TODO(synk): handle the ragged tail in-kernel (BoundedSlice / masked
            # tail tile) to avoid the wrapper-side pad/slice HBM passes.
            l_pad = _round_up(L, 128)
            m = l_pad // 128
            d = next(d for d in range(eff_max_tl // 128, 0, -1) if m % d == 0)
            tl = 128 * d

    tile_bytes = resident + per_len * tl
    vmem_limit = int(min(64 << 20, max(32 << 20, tile_bytes + (8 << 20))))
    return tl, l_pad, vmem_limit


def upsample(x, weight, bias, *, max_tl=1024):
    """ConvTranspose1d(in_ch, out_ch, kernel_size=2, stride=2).

    x      : (N, C_in, L)       float32 or bfloat16
    weight : (C_in, C_out, 2)   (PyTorch ConvTranspose1d weight layout)
    bias   : (C_out,)
    returns: (N, C_out, 2*L)    same dtype as x
    """
    N, C_in, L = x.shape
    C_out = weight.shape[1]
    itemsize = jnp.dtype(x.dtype).itemsize

    TL, L_pad, vmem_limit = _plan_length_tiling(N, C_in, C_out, L, max_tl, itemsize)
    num_l = L_pad // TL

    if L_pad != L:
        x = jnp.pad(x, ((0, 0), (0, 0), (0, L_pad - L)))

    # Fuse the two kernel taps into one weight matrix / one bias column.
    # Weights follow the activation dtype (bf16 inputs -> bf16 weights, f32 acc);
    # bias stays f32 since it is added to the f32 accumulator.
    w_cat = jnp.transpose(weight, (2, 1, 0)).reshape(2 * C_out, C_in).astype(x.dtype)
    b_cat = jnp.tile(bias, 2).reshape(2 * C_out, 1).astype(jnp.float32)
    # TODO(synk): for very large channel counts (weights > ~16 MiB) add a C_in
    # reduction grid axis ("arbitrary", innermost) with an f32 VMEM accumulator
    # so only a (2*C_out, tk) weight slab is resident.

    cost = pl.CostEstimate(
        flops=4 * N * C_out * C_in * L_pad,
        bytes_accessed=itemsize * N * (C_in + 2 * C_out) * L_pad
        + itemsize * 2 * C_out * C_in + 4 * 2 * C_out,
        transcendentals=0,
    )

    out = pl.pallas_call(
        _upsample_kernel,
        out_shape=jax.ShapeDtypeStruct((N, C_out, 2 * L_pad), x.dtype),
        grid_spec=pltpu.PrefetchScalarGridSpec(
            num_scalar_prefetch=0,
            grid=(N, num_l),
            in_specs=[
                pl.BlockSpec((1, C_in, TL), lambda n, l: (n, 0, l)),
                pl.BlockSpec((2 * C_out, C_in), lambda n, l: (0, 0)),
                pl.BlockSpec((2 * C_out, 1), lambda n, l: (0, 0)),
            ],
            out_specs=pl.BlockSpec((1, C_out, 2 * TL), lambda n, l: (n, 0, l)),
        ),
        compiler_params=pltpu.CompilerParams(
            dimension_semantics=("parallel", "parallel"),
            vmem_limit_bytes=vmem_limit,
        ),
        cost_estimate=cost,
    )(x, w_cat, b_cat)

    if L_pad != L:
        out = out[:, :, : 2 * L]
    return out


def _reference(x, weight, bias):
    # Pure-JAX f32 reference for the stride-2, kernel-2 transposed conv.
    N, _, L = x.shape
    C_out = weight.shape[1]
    xf = x.astype(jnp.float32)
    wf = weight.astype(jnp.float32)
    y_taps = jnp.einsum("ncl,cok->nolk", xf, wf) + bias[None, :, None, None]
    return y_taps.reshape(N, C_out, 2 * L)


if __name__ == "__main__":
    key = jax.random.PRNGKey(0)

    # --- 1. small case (single length tile, matches module defaults) ---------
    k_x, k_w, k_b, key = jax.random.split(key, 4)
    N, C_in, C_out, L = 2, 8, 4, 16
    x = jax.random.normal(k_x, (N, C_in, L), dtype=jnp.float32)
    weight = jax.random.normal(k_w, (C_in, C_out, 2), dtype=jnp.float32) * 0.1
    bias = jax.random.normal(k_b, (C_out,), dtype=jnp.float32) * 0.1
    y = upsample(x, weight, bias)
    jax.block_until_ready(y)
    assert y.shape == (N, C_out, 2 * L)
    assert jnp.allclose(y, _reference(x, weight, bias), atol=1e-5, rtol=1e-5)

    # --- 2. tiled length path -------------------------------------------------
    k_x, k_w, k_b, key = jax.random.split(key, 4)
    N2, C_in2, C_out2, L2 = 2, 16, 8, 256
    x2 = jax.random.normal(k_x, (N2, C_in2, L2), dtype=jnp.float32)
    weight2 = jax.random.normal(k_w, (C_in2, C_out2, 2), dtype=jnp.float32) * 0.1
    bias2 = jax.random.normal(k_b, (C_out2,), dtype=jnp.float32) * 0.1
    y2 = upsample(x2, weight2, bias2, max_tl=128)            # 2 length tiles
    jax.block_until_ready(y2)
    assert y2.shape == (N2, C_out2, 2 * L2)
    assert jnp.allclose(y2, _reference(x2, weight2, bias2), atol=1e-5, rtol=1e-5)

    # --- 3. ragged length -> padded + sliced (no giant-block fallback) --------
    k_x, key = jax.random.split(key)
    L3 = 200
    x3 = jax.random.normal(k_x, (N2, C_in2, L3), dtype=jnp.float32)
    y3 = upsample(x3, weight2, bias2, max_tl=128)            # pads to 256, slices back
    jax.block_until_ready(y3)
    assert y3.shape == (N2, C_out2, 2 * L3)
    assert jnp.allclose(y3, _reference(x3, weight2, bias2), atol=1e-5, rtol=1e-5)

    # --- 4. N == 1: tile split so both v7x TensorCores get work ---------------
    k_x, k_w, k_b, key = jax.random.split(key, 4)
    C4, L4 = 8, 512
    x4 = jax.random.normal(k_x, (1, C4, L4), dtype=jnp.float32)
    weight4 = jax.random.normal(k_w, (C4, C4, 2), dtype=jnp.float32) * 0.1
    bias4 = jax.random.normal(k_b, (C4,), dtype=jnp.float32) * 0.1
    y4 = upsample(x4, weight4, bias4)                        # >= 2 grid steps
    jax.block_until_ready(y4)
    assert y4.shape == (1, C4, 2 * L4)
    assert jnp.allclose(y4, _reference(x4, weight4, bias4), atol=1e-5, rtol=1e-5)

    # --- 5. bf16 activations/weights (halved HBM traffic), f32 accumulation ---
    x5 = x2.astype(jnp.bfloat16)
    y5 = upsample(x5, weight2, bias2)
    jax.block_until_ready(y5)
    assert y5.dtype == jnp.bfloat16 and y5.shape == (N2, C_out2, 2 * L2)
    assert jnp.allclose(y5.astype(jnp.float32), _reference(x2, weight2, bias2),
                        atol=1e-1)

    print("KERNEL_OK")
</pallas_src>

<mosaic_0001>
module attributes {stable_mosaic.version = 11 : i64} {
  func.func @_upsample_kernel(%arg0: i32, %arg1: i32, %arg2: memref<1x8x16xf32, #tpu.memory_space<vmem>>, %arg3: memref<8x8xf32, #tpu.memory_space<vmem>>, %arg4: memref<8x1xf32, #tpu.memory_space<vmem>>, %arg5: memref<1x4x32xf32, #tpu.memory_space<vmem>>) attributes {dimension_semantics = [#tpu.dimension_semantics<parallel>, #tpu.dimension_semantics<parallel>], iteration_bounds = array<i64: 2, 1>, scalar_prefetch = 0 : i64, scratch_operands = 0 : i64, tpu.core_type = #tpu.core_type<tc>, window_params = [{transform_indices = @transform_0, window_bounds = array<i64: 1, 8, 16>}, {pipeline_mode = #tpu.pipeline_mode<synchronous>, transform_indices = @transform_1, window_bounds = array<i64: 8, 8>}, {pipeline_mode = #tpu.pipeline_mode<synchronous>, transform_indices = @transform_2, window_bounds = array<i64: 8, 1>}, {transform_indices = @transform_3, window_bounds = array<i64: 1, 4, 32>}]} {
    %c0 = arith.constant 0 : index
    %c0_0 = arith.constant 0 : index
    %c0_1 = arith.constant 0 : index
    %0 = vector.load %arg2[%c0, %c0_0, %c0_1] : memref<1x8x16xf32, #tpu.memory_space<vmem>>, vector<1x8x16xf32>
    %1 = vector.shape_cast %0 : vector<1x8x16xf32> to vector<8x16xf32>
    %c0_2 = arith.constant 0 : index
    %c0_3 = arith.constant 0 : index
    %2 = vector.load %arg3[%c0_2, %c0_3] : memref<8x8xf32, #tpu.memory_space<vmem>>, vector<8x8xf32>
    %cst = arith.constant dense<0.000000e+00> : vector<8x16xf32>
    %3 = tpu.matmul %2, %1, %cst {dimension_numbers = #tpu.dot_dimension_numbers<[1], [0], [0], [1], [0, 0, 1, 1], [], []>} : vector<8x8xf32>, vector<8x16xf32>, vector<8x16xf32> -> vector<8x16xf32>
    %c0_4 = arith.constant 0 : index
    %c0_5 = arith.constant 0 : index
    %4 = vector.load %arg4[%c0_4, %c0_5] : memref<8x1xf32, #tpu.memory_space<vmem>>, vector<8x1xf32>
    %5 = vector.broadcast %4 : vector<8x1xf32> to vector<8x16xf32>
    %6 = arith.addf %3, %5 : vector<8x16xf32>
    %7 = vector.extract_strided_slice %6 {offsets = [0, 0], sizes = [4, 16], strides = [1, 1]} : vector<8x16xf32> to vector<4x16xf32>
    %8 = vector.extract_strided_slice %6 {offsets = [4, 0], sizes = [4, 16], strides = [1, 1]} : vector<8x16xf32> to vector<4x16xf32>
    %9 = vector.shape_cast %7 : vector<4x16xf32> to vector<4x16x1xf32>
    %10 = vector.shape_cast %8 : vector<4x16xf32> to vector<4x16x1xf32>
    %11 = tpu.concatenate %9, %10 in 2 : vector<4x16x1xf32>, vector<4x16x1xf32> -> vector<4x16x2xf32>
    %12 = vector.shape_cast %11 : vector<4x16x2xf32> to vector<4x32xf32>
    %c0_6 = arith.constant 0 : index
    %c0_7 = arith.constant 0 : index
    %c0_8 = arith.constant 0 : index
    %13 = vector.load %arg5[%c0_6, %c0_7, %c0_8] : memref<1x4x32xf32, #tpu.memory_space<vmem>>, vector<1x4x32xf32>
    %14 = vector.shape_cast %13 : vector<1x4x32xf32> to vector<4x32xf32>
    %15 = vector.shape_cast %12 : vector<4x32xf32> to vector<1x4x32xf32>
    tpu.vector_store %arg5[%c0_6, %c0_7, %c0_8], %15 {strides = array<i32>} : memref<1x4x32xf32, #tpu.memory_space<vmem>>, vector<1x4x32xf32>,
    return
  }
  func.func @transform_0(%arg0: i32, %arg1: i32) -> (i32, i32, i32) {
    %c0_i32 = arith.constant 0 : i32
    %c0_i32_0 = arith.constant 0 : i32
    return %arg0, %c0_i32, %arg1 : i32, i32, i32
  }
  func.func @transform_1(%arg0: i32, %arg1: i32) -> (i32, i32) {
    %c0_i32 = arith.constant 0 : i32
    %c0_i32_0 = arith.constant 0 : i32
    %c0_i32_1 = arith.constant 0 : i32
    return %c0_i32, %c0_i32_0 : i32, i32
  }
  func.func @transform_2(%arg0: i32, %arg1: i32) -> (i32, i32) {
    %c0_i32 = arith.constant 0 : i32
    %c0_i32_0 = arith.constant 0 : i32
    %c0_i32_1 = arith.constant 0 : i32
    return %c0_i32, %c0_i32_0 : i32, i32
  }
  func.func @transform_3(%arg0: i32, %arg1: i32) -> (i32, i32, i32) {
    %c0_i32 = arith.constant 0 : i32
    %c0_i32_0 = arith.constant 0 : i32
    return %arg0, %c0_i32, %arg1 : i32, i32, i32
  }
}

</mosaic_0001>

<bundles_post_ra>
// kernel: tpu_custom_call.1
= control target key start
LH: loop header
LB: loop body
LE: loop exit
PB: predicated region body
PF: predicated region fallthrough
CT: control target
= control target key end

     0   :  { %8 = vsyncpa [#allocation3], 0  ;;  %s1141_s0 = inlined_call_operand.hbm [shape: f32[2,8,16], index: 0, kind: input, shape index: {}]   ;;  %s1142_s1 = inlined_call_operand.vmem [shape: f32[8,8], index: 1, kind: input, shape index: {}]   ;;  %s1143_s2 = inlined_call_operand.vmem [shape: f32[8,1], index: 2, kind: input, shape index: {}]   ;;  %s1144_s3 = inlined_call_operand.hbm [shape: f32[2,4,32], index: 3, kind: output, shape index: {}]  }
   0x1   :  { %10 = vsyncpa [#allocation3 + $0x1], 0 }
   0x2   :  { %11 = vsyncpa [#allocation4], 0 }
   0x3   :  { %13 = vsyncpa [#allocation4 + $0x1], 0  ;;  %s960_s12 = smov 0   ;;  %s962_s13 = smov 0  }
   0x4   :  { %s964_s14 = smov 0   ;;  %s966_s15 = smov 0  }
   0x5   :  { %s968_s16 = smov 0   ;;  %s970_s17 = smov 0  }
   0x6 LB: > { %s704_s18 = sadd.s32 4294967295, %s916_s17   ;;  %s705_s19 = sadd.s32 4294967294, %s916_s17   ;;  %s916_s17 = sphi %s970_s17, %s19_s17   ;;  %s912_s16 = sphi %s968_s16, %s1156_s16   ;;  %s908_s15 = sphi %s966_s15, %s1155_s15   ;;  %s904_s14 = sphi %s964_s14, %s1154_s14   ;;  %s900_s13 = sphi %s962_s13, %s1153_s13   ;;  %s896_s12 = sphi %s960_s12, %s1152_s12  }
   0x7   : > { %s31_s20 = sadd.s32 1, %s912_s16  ;;  %s40_s21 = sadd.s32 1, %s904_s14 }
   0x8   : > { %p33_p0 = scmp.ge.s32.totalorder %s31_s20, 2  ;;  %p47_p1 = scmp.ne.s32.totalorder %s904_s14, %s900_s13 }
   0x9   : > { %p48_p2 = scmp.eq.s32.totalorder %s916_s17, 0  ;;  %p53_p3 = scmp.ne.s32.totalorder %s900_s13, %s896_s12 }
   0xa   : > { %s1158_s20 = smov (%p33_p0, %s31_s20), 0  ;;  %p54_p5 = scmp.eq.s32.totalorder %s704_s18, 0 }
   0xb   : > { %p1001_p4 = por %p48_p2, %p47_p1  ;;  %s35_s23 = ssub.s32 %s912_s16, %s1158_s20 }
   0xc   : > { %p121_p6 = scmp.eq.s32.totalorder %s704_s18, 1  ;;  %p38_p7 = scmp.eq.s32.totalorder %s35_s23, 0 }
   0xd   : > { %p1007_p8 = por %p54_p5, %p53_p3  ;;  %p127_p10 = scmp.eq.s32.totalorder %s705_s19, 1 }
   0xe   : > { %p1011_p9 = por %p121_p6, %p47_p1  ;;  %p737_p13 = scmp.lt.s32.totalorder %s916_s17, 2 }
   0xf   : > { %s1016_s26 = scalar_select %p38_p7, %s904_s14, %s40_s21  }
  0x10   : > { %p1018_p11 = por %p127_p10, %p53_p3  ;;  %s153_s28 = sand.u32 1, %s904_s14  }
  0x11   : > { %s708_s29 = sshll.u32 %s153_s28, 3  ;;  %s709_s30 = sshll.u32 %s912_s16, 7 }
  0x12   : > { %s1148_s27 = scalar_select %p1018_p11, 1, 0 }
  0x13   : > { %s163_s6 = scalar_lea.hbm %s1141_s0, %s709_s30  ;;  %s157_s7 = scalar_lea.vmem [#allocation2], %s708_s29 }
  0x14   : > { %s165_s8 = sshll.u32 %s157_s7, 4  ;;  %p1031_p0 = pnand %p737_p13, %p1001_p4  ;;  %s166_s8 = int_to_ptr.vmem [resolvable:$true] %s165_s8 }
  0x15   : > { %p710_p1 = scmp.ge.s32.totalorder %s916_s17, 1  ;;  %p170_p2 = scmp.lt.s32.totalorder %s916_s17, 3 }
  0x16   : > { %s154_s10 = scalar_lea.sflag [#allocation3], %s153_s28  ;;  %p810_p3 = pneg %p1031_p0 }
  0x17   : > { %s821_s11 = scalar_lea.vmem %s166_s8, 128  ;;  %s918_s18 = smov [#allocation2]  }
  0x18   : > { %p822_p5 = scmp.ne.s32.totalorder %s166_s8, %s821_s11  ;;  %s826_s19 = sshll.u32 %s918_s18, 4  ;;  %s827_s19 = int_to_ptr.vmem [resolvable:$false] %s826_s19 }
  0x19   : > { %s828_s21 = scalar_lea.vmem %s827_s19, 256  ;;  %p829_p10 = scmp.lt.s32.totalorder %s166_s8, %s827_s19 }
  0x1a   : > { %p824_p6 = pnand %p822_p5, %p810_p3  ;;  %p830_p12 = scmp.lt.s32.totalorder %s828_s21, %s821_s11 }
  0x1c   : > { %p825_p7 = pneg %p824_p6  ;;  %p831_p4 = por %p830_p12, %p829_p10 }
  0x1e   : > { %p832_p13 = pnand %p831_p4, %p825_p7 }
  0x20   : > { %835 = shalt.err (!%p832_p13)
}
  0x21   : > { %732 = dma.hbm_to_vmem [thread:$0]  (!%p1031_p0), %s163_s6, 128, %s166_s8, %s154_s10  }
  0x22   : > { %p171_p11 = pnand %p710_p1, %p170_p2 }
  0x23   : > { %s1046_s22 = sand.u32 (!%p171_p11), 1, %s900_s13  }
  0x24   : > { %174 = sbr.rel (%p171_p11) target bundleno = 537 (0x219), region = 32  ;;  %s711_s23 = sshll.u32 (!%p171_p11), %s1046_s22, 3 }
  0x25   : > { %s177_s28 = scalar_lea.sflag (!%p171_p11), [#allocation3], %s1046_s22  ;;  %s180_s29 = scalar_lea.vmem (!%p171_p11), [#allocation2], %s711_s23 }
  0x29   : > { %887 = dma.done.wait (%p1007_p8), %s177_s28, 128  }
  0x2a   : > { %889 = vsyncadd (%p1007_p8), %s177_s28, 4294967168  ;;  %v919_v0 = vmov 0.0   ;;  %vm920_vm0 = vmmov 0   ;;  %v921_v1 = vmov 0   ;;  %vm211_vm1 = vcmask 64512   ;;  %v203_v2 = vld [vmem:[%s180_s29] sm:$0xff] }
  0x2b   : > { %720 = vmatprep.subr.mxu0 %v919_v0  ;;  %722 = vmatprep.mubr.msk.f32.mxu0 %vm920_vm0, %v919_v0  ;;  %v204_v3 = vld [vmem:[%s1142_s1] sm:$0xff]  ;;  %v285_v5 = vlaneseq  ;;  %v922_v31 = vmov 1983009808   ;;  %v923_v33 = vmov 1934713408   ;;  %vm373_vm2 = vcmask 7168  }
  0x2c   : > { %807 = vset.pattern.permute.xlu0 %v921_v1  ;;  %v205_v4 = vld [vmem:[%s1143_s2] sm:$0xff]  ;;  %721 = vmatpush3.msra.mxu0 %v203_v2  ;;  %v385_v32 = vunpack.c.l.s4 %v922_v31  ;;  %v417_v34 = vunpack.c.l.s4 %v923_v33  ;;  %s924_s24 = smov 4   ;;  %s925_s7 = smov 2   ;;  %vm578_vm3 = vcmask 15360   ;;  %vm580_vm4 = vcmask 31744  }
  0x2d   : > { %208 = vperm.xlu0 %807, %v205_v4   ;;  %723 = vmatmul.mubr.msk.f32.vlgmr.msra.gmra.mxu0 %vm211_vm1, %v204_v3  ;;  %v286_v6 = vshrl.u32 %v285_v5, 7  ;;  %s926_s8 = smov 8   ;;  %s927_s9 = smov 6   ;;  %vm582_vm5 = vcmask 48128   ;;  %vm585_vm6 = vcmask 80896   ;;  %vm587_vm7 = vcmask 97280  }
  0x2e   : > { %v386_v37 = vunpack.c.0.s8 %v385_v32  ;;  %v418_v38 = vunpack.c.0.s8 %v417_v34  ;;  %s928_s10 = smov 12   ;;  %s929_s11 = smov 10   ;;  %vm589_vm8 = vcmask 113664   ;;  %vm591_vm9 = vcmask 130048  }
  0x2f   : > { %v298_v8 = vsub.s32 1, %v286_v6  ;;  %v287_v9 = vsub.s32 0, %v286_v6  ;;  %v309_v15 = vsub.s32 2, %v286_v6  ;;  %v320_v16 = vsub.s32 3, %v286_v6  ;;  %s930_s18 = smov 14   ;;  %s931_s19 = smov 16  }
  0x30   : > { %v331_v19 = vsub.s32 4, %v286_v6  ;;  %v342_v20 = vsub.s32 5, %v286_v6  ;;  %v353_v23 = vsub.s32 6, %v286_v6  ;;  %v364_v24 = vsub.s32 7, %v286_v6  ;;  %s932_s21 = smov 18   ;;  %s933_s23 = smov 20  }
  0x31   : > { %v389_v39 = vsub.s32 %v386_v37, %v286_v6  ;;  %v1067_v50 = vsub.s32 %v418_v38, %v286_v6  ;;  %s934_s28 = smov 22   ;;  %s935_s29 = smov 24   ;;  %vm593_vm10 = vcmask 146432   ;;  %vm595_vm11 = vcmask 162816  }
  0x32   : > { %s936_s30 = smov 26   ;;  %s937_s4 = smov 28   ;;  %vm597_vm12 = vcmask 179200   ;;  %vm599_vm13 = vcmask 195584   ;;  %vm601_vm14 = vcmask 211968   ;;  %vm603_vm15 = vcmask 228352  }
  0x33   : > { %s938_s5 = smov 30   ;;  %s712_s6 = sshll.u32 %s1046_s22, 2  ;;  %vm605_vm0 = vcmask 244736  }
  0xa8   : > { %v209_v7 = vpop.permute.xlu0 %208 }
  0xed   : > { %v281_v10 = vpop.f32.mrf.mxu0 }
  0xee   : > { %v282_v11 = vadd.f32 %v281_v10, %v209_v7 }
  0xef   : > { %v724_v12 = vpop.f32.mrf.mxu0 }
  0xf0   : > { %v299_v13 = vrot.slane %v282_v11, %v298_v8  ;;  %v288_v14 = vrot.slane %v282_v11, %v287_v9  ;;  %v310_v17 = vrot.slane %v282_v11, %v309_v15  ;;  %v321_v18 = vrot.slane %v282_v11, %v320_v16 }
  0xf1   : > { %v332_v21 = vrot.slane %v282_v11, %v331_v19  ;;  %v343_v22 = vrot.slane %v282_v11, %v342_v20  ;;  %v354_v25 = vrot.slane %v282_v11, %v353_v23  ;;  %v365_v26 = vrot.slane %v282_v11, %v364_v24 }
  0xf2   : > { %301 = vbcast.lane.b32.xlu1 %v299_v13, 256  ;;  %290 = vbcast.lane.b32.xlu0 %v288_v14, 256 }
  0xf6   : > { %312 = vbcast.lane.b32.xlu1 %v310_v17, 256  ;;  %323 = vbcast.lane.b32.xlu0 %v321_v18, 256 }
  0xfa   : > { %334 = vbcast.lane.b32.xlu1 %v332_v21, 256  ;;  %345 = vbcast.lane.b32.xlu0 %v343_v22, 256 }
  0xfe   : > { %356 = vbcast.lane.b32.xlu1 %v354_v25, 256  ;;  %367 = vbcast.lane.b32.xlu0 %v365_v26, 256 }
 0x102   : > { %294 = vbcast.lane.b32.xlu1 %v288_v14, 264  ;;  %305 = vbcast.lane.b32.xlu0 %v299_v13, 264 }
 0x106   : > { %316 = vbcast.lane.b32.xlu1 %v310_v17, 264  ;;  %327 = vbcast.lane.b32.xlu0 %v321_v18, 264 }
 0x10a   : > { %338 = vbcast.lane.b32.xlu1 %v332_v21, 264  ;;  %349 = vbcast.lane.b32.xlu0 %v343_v22, 264 }
 0x10e   : > { %360 = vbcast.lane.b32.xlu1 %v354_v25, 264  ;;  %371 = vbcast.lane.b32.xlu0 %v365_v26, 264 }
 0x164   : > { %v302_v27 = vpop.permute.xlu1 %301  ;;  %v291_v28 = vpop.permute.xlu0 %290 }
 0x168   : > { %v313_v29 = vpop.permute.xlu1 %312  ;;  %v324_v30 = vpop.permute.xlu0 %323 }
 0x16c   : > { %v335_v35 = vpop.permute.xlu1 %334  ;;  %v346_v36 = vpop.permute.xlu0 %345 }
 0x16d   : > { %v374_v42 = vsel %vm373_vm2, %v291_v28, %v335_v35  ;;  %v376_v43 = vsel %vm373_vm2, %v302_v27, %v346_v36 }
 0x170   : > { %v357_v40 = vpop.permute.xlu1 %356  ;;  %v368_v41 = vpop.permute.xlu0 %367 }
 0x171   : > { %v378_v44 = vsel %vm373_vm2, %v313_v29, %v357_v40  ;;  %v380_v45 = vsel %vm373_vm2, %v324_v30, %v368_v41 }
 0x172   : > { %v382_v46 = vcombine.low %v374_v42, %v378_v44  ;;  %v383_v47 = vcombine.high %v374_v42, %v378_v44  ;;  %v398_v48 = vcombine.low %v376_v43, %v380_v45  ;;  %v399_v49 = vcombine.high %v376_v43, %v380_v45 }
 0x174   : > { %v390_v51 = vrot.slane %v382_v46, %v389_v39  ;;  %v397_v52 = vrot.slane %v383_v47, %v389_v39  ;;  %v406_v53 = vrot.slane %v398_v48, %v389_v39  ;;  %v413_v54 = vrot.slane %v399_v49, %v389_v39  ;;  %v295_v55 = vpop.permute.xlu1 %294  ;;  %v306_v56 = vpop.permute.xlu0 %305 }
 0x176   : > { %v414_v57 = vcombine.low %v390_v51, %v406_v53  ;;  %v415_v58 = vcombine.high %v390_v51, %v406_v53  ;;  %v430_v63 = vcombine.low %v397_v52, %v413_v54  ;;  %v431_v5 = vcombine.high %v397_v52, %v413_v54 }
 0x178   : > { %v317_v59 = vpop.permute.xlu1 %316  ;;  %v328_v60 = vpop.permute.xlu0 %327  ;;  %v429_v61 = vrot.slane %v415_v58, %v1067_v50  ;;  %v1071_v62 = vrot.slane %v414_v57, %v1067_v50  ;;  %v438_v4 = vrot.slane %v430_v63, %v1067_v50  ;;  %v445_v9 = vrot.slane %v431_v5, %v1067_v50 }
 0x17a   : > { %523 = vrot.lane.b32.xlu0 %v429_v61, %s924_s24  ;;  %v446_v1 = vcombine.high %v1071_v62, %v919_v0  ;;  %v447_v6 = vcombine.high %v429_v61, %v919_v0  ;;  %v448_v10 = vcombine.high %v438_v4, %v919_v0  ;;  %v449_v21 = vcombine.high %v445_v9, %v919_v0  ;;  %s715_s24 = sshll.u32 %s908_s15, 6  ;;  %s939_s15 = smov [#allocation5]  }
 0x17c   : > { %v339_v2 = vpop.permute.xlu1 %338  ;;  %519 = vrot.lane.b32.xlu1 %v446_v1, %s925_s7  ;;  %v350_v3 = vpop.permute.xlu0 %349  ;;  %s202_s7 = scalar_lea.vmem [#allocation5], %s712_s6 }
 0x17d   : > { %v375_v11 = vsel %vm373_vm2, %v295_v55, %v339_v2  ;;  %v377_v12 = vsel %vm373_vm2, %v306_v56, %v350_v3 }
 0x17e   : > { %531 = vrot.lane.b32.xlu0 %v438_v4, %s926_s8  ;;  %s624_s8 = sshll.u32 %s202_s7, 4  ;;  %s625_s8 = int_to_ptr.vmem [resolvable:$true] %s624_s8 }
 0x180   : > { %v361_v7 = vpop.permute.xlu1 %360  ;;  %527 = vrot.lane.b32.xlu1 %v447_v6, %s927_s9  ;;  %v372_v8 = vpop.permute.xlu0 %371 }
 0x181   : > { %v379_v13 = vsel %vm373_vm2, %v317_v59, %v361_v7  ;;  %v381_v14 = vsel %vm373_vm2, %v328_v60, %v372_v8 }
 0x182   : > { %v450_v15 = vcombine.low %v375_v11, %v379_v13  ;;  %v451_v16 = vcombine.high %v375_v11, %v379_v13  ;;  %v466_v17 = vcombine.low %v377_v12, %v381_v14  ;;  %v467_v18 = vcombine.high %v377_v12, %v381_v14  ;;  %539 = vrot.lane.b32.xlu0 %v445_v9, %s928_s10 }
 0x184   : > { %v458_v19 = vrot.slane %v450_v15, %v389_v39  ;;  %v474_v20 = vrot.slane %v466_v17, %v389_v39  ;;  %535 = vrot.lane.b32.xlu1 %v448_v10, %s929_s11  ;;  %v465_v22 = vrot.slane %v451_v16, %v389_v39  ;;  %v481_v23 = vrot.slane %v467_v18, %v389_v39  ;;  %s1099_s11 = scalar_lea.hbm %s1144_s3, %s715_s24 }
 0x186   : > { %v482_v24 = vcombine.low %v458_v19, %v474_v20  ;;  %v483_v25 = vcombine.high %v458_v19, %v474_v20  ;;  %v498_v29 = vcombine.low %v465_v22, %v481_v23  ;;  %v499_v32 = vcombine.high %v465_v22, %v481_v23 }
 0x188   : > { %543 = vrot.lane.b32.xlu1 %v449_v21, %s930_s18  ;;  %v490_v26 = vrot.slane %v482_v24, %v1067_v50  ;;  %v497_v28 = vrot.slane %v483_v25, %v1067_v50  ;;  %v506_v31 = vrot.slane %v498_v29, %v1067_v50  ;;  %v513_v34 = vrot.slane %v499_v32, %v1067_v50  ;;  %s610_s18 = scalar_lea.sflag [#allocation4], %s1046_s22 }
 0x18a   : > { %547 = vrot.lane.b32.xlu0 %v490_v26, %s931_s19  ;;  %v514_v27 = vcombine.high %v490_v26, %v919_v0  ;;  %v515_v30 = vcombine.high %v497_v28, %v919_v0  ;;  %v516_v33 = vcombine.high %v506_v31, %v919_v0  ;;  %v517_v35 = vcombine.high %v513_v34, %v919_v0  ;;  %s836_s19 = scalar_lea.vmem %s625_s8, 64 }
 0x18b   : > { %p837_p8 = scmp.ne.s32.totalorder %s625_s8, %s836_s19 }
 0x18c   : > { %551 = vrot.lane.b32.xlu1 %v514_v27, %s932_s21  ;;  %s840_s21 = sshll.u32 %s939_s15, 4  ;;  %s841_s21 = int_to_ptr.vmem [resolvable:$false] %s840_s21 }
 0x18d   : > { %p838_p11 = pnand %p837_p8, %p1011_p9  ;;  %p843_p0 = scmp.lt.s32.totalorder %s625_s8, %s841_s21 }
 0x18e   : > { %555 = vrot.lane.b32.xlu0 %v497_v28, %s933_s23  ;;  %s842_s23 = scalar_lea.vmem %s841_s21, 128 }
 0x18f   : > { %p839_p12 = pneg %p838_p11  ;;  %p844_p1 = scmp.lt.s32.totalorder %s842_s23, %s836_s19 }
 0x190   : > { %559 = vrot.lane.b32.xlu1 %v515_v30, %s934_s28 }
 0x191   : > { %p845_p2 = por %p844_p1, %p843_p0 }
 0x192   : > { %563 = vrot.lane.b32.xlu0 %v506_v31, %s935_s29 }
 0x193   : > { %p846_p3 = pnand %p845_p2, %p839_p12 }
 0x194   : > { %567 = vrot.lane.b32.xlu1 %v516_v33, %s936_s30 }
 0x196   : > { %571 = vrot.lane.b32.xlu0 %v513_v34, %s937_s4 }
 0x198   : > { %575 = vrot.lane.b32.xlu1 %v517_v35, %s938_s5 }
 0x1ec   : > { %v524_v36 = vpop.permute.xlu0 %523 }
 0x1ee   : > { %v520_v37 = vpop.permute.xlu1 %519 }
 0x1ef   : > { %v579_v38 = vsel %vm578_vm3, %v1071_v62, %v520_v37 }
 0x1f0   : > { %v532_v39 = vpop.permute.xlu0 %531  ;;  %v581_v41 = vsel %vm580_vm4, %v579_v38, %v524_v36 }
 0x1f2   : > { %v528_v40 = vpop.permute.xlu1 %527 }
 0x1f3   : > { %v583_v42 = vsel %vm582_vm5, %v581_v41, %v528_v40 }
 0x1f4   : > { %v584_v44 = vsel %vm211_vm1, %v583_v42, %v532_v39  ;;  %v540_v0 = vpop.permute.xlu0 %539  ;;  %vm607_vm1 = vcmask 257024  }
 0x1f6   : > { %v536_v43 = vpop.permute.xlu1 %535 }
 0x1f7   : > { %v586_v45 = vsel %vm585_vm6, %v584_v44, %v536_v43 }
 0x1f8   : > { %v588_v47 = vsel %vm587_vm7, %v586_v45, %v540_v0 }
 0x1fa   : > { %v544_v46 = vpop.permute.xlu1 %543 }
 0x1fb   : > { %v590_v48 = vsel %vm589_vm8, %v588_v47, %v544_v46 }
 0x1fc   : > { %v548_v49 = vpop.permute.xlu0 %547 }
 0x1fd   : > { %v592_v50 = vsel %vm591_vm9, %v590_v48, %v548_v49 }
 0x1fe   : > { %v552_v51 = vpop.permute.xlu1 %551 }
 0x1ff   : > { %v594_v52 = vsel %vm593_vm10, %v592_v50, %v552_v51 }
 0x200   : > { %v556_v53 = vpop.permute.xlu0 %555 }
 0x201   : > { %v596_v54 = vsel %vm595_vm11, %v594_v52, %v556_v53 }
 0x202   : > { %v560_v55 = vpop.permute.xlu1 %559 }
 0x203   : > { %v598_v56 = vsel %vm597_vm12, %v596_v54, %v560_v55 }
 0x204   : > { %v564_v57 = vpop.permute.xlu0 %563 }
 0x205   : > { %v600_v58 = vsel %vm599_vm13, %v598_v56, %v564_v57 }
 0x206   : > { %v568_v59 = vpop.permute.xlu1 %567 }
 0x207   : > { %v602_v60 = vsel %vm601_vm14, %v600_v58, %v568_v59 }
 0x208   : > { %v572_v61 = vpop.permute.xlu0 %571 }
 0x209   : > { %v604_v62 = vsel %vm603_vm15, %v602_v60, %v572_v61 }
 0x20a   : > { %v576_v63 = vpop.permute.xlu1 %575 }
 0x20b   : > { %v606_v1 = vsel %vm605_vm0, %v604_v62, %v576_v63 }
 0x20c   : > { %608 = vst.msk [vmem:[%s202_s7] sm:$0xf] %vm607_vm1, %v606_v1 }
 0x20d   : > { %849 = shalt.err (!%p846_p3)
}
 0x20e   : > { %s850_s28 = scalar_lea.hbm %s1099_s11, 64  ;;  %s854_s30 = scalar_lea.hbm %s1144_s3, 128 }
 0x20f   : > { %p851_p5 = scmp.ne.s32.totalorder %s1099_s11, %s850_s28  ;;  %p855_p10 = scmp.lt.s32.totalorder %s1099_s11, %s1144_s3 }
 0x210   : > { %p856_p4 = scmp.lt.s32.totalorder %s854_s30, %s850_s28 }
 0x211   : > { %p852_p6 = pnand %p851_p5, %p1011_p9 }
 0x212   : > { %p857_p13 = por %p856_p4, %p855_p10 }
 0x213   : > { %p853_p7 = pneg %p852_p6 }
 0x215   : > { %p858_p8 = pnand %p857_p13, %p853_p7 }
 0x217   : > { %861 = shalt.err (!%p858_p8)
}
 0x218   : > { %727 = dma.vmem_to_hbm [thread:$0]  (%p1011_p9), %s625_s8, 64, %s1099_s11, %s610_s18  }
 0x219 PF: > { %s636_s6 = sand.u32 1, %s896_s12   ;;  %p1150_p11 = scmp.ne.s32.totalorder %s1148_s27, 0 }
 0x21a   : > { %p1151_p12 = scmp.ge.s32.totalorder %s916_s17, 2  ;;  %s637_s24 = scalar_lea.sflag [#allocation4], %s636_s6 }
 0x21c   : > { %p734_p0 = pnand %p1151_p12, %p1150_p11 }
 0x21e   : > { %p735_p1 = pneg %p734_p0 }
 0x220   : > { %891 = dma.done.wait (%p735_p1), %s637_s24, 64  }
 0x221   : > { %893 = vsyncadd (%p735_p1), %s637_s24, 4294967232  ;;  %s19_s17 = sadd.s32 1, %s916_s17   ;;  %s1152_s12 = smov %s900_s13 }
 0x222   : > { %p16_p2 = scmp.ge.s32.totalorder %s19_s17, 4   ;;  %s1153_s13 = smov %s904_s14 }
 0x223   : > { %s1154_s14 = smov %s1016_s26  ;;  %s1155_s15 = smov %s912_s16 }
 0x224   : > { %s1156_s16 = smov %s1158_s20  ;;  %18 = sbr.rel (!%p16_p2) target bundleno = 6 (0x6), region = 77 }
 0x229   :  { %642 = vsyncpa [#allocation3], 1 }
 0x22a   :  { %644 = vsyncpa [#allocation3 + $0x1], 1 }
 0x22b   :  { %645 = vsyncpa [#allocation4], 1 }
 0x22c   :  { %647 = vsyncpa [#allocation4 + $0x1], 1 }

</bundles_post_ra>
